<compile_context>
chip_gen: v7x
topology: tpu7x:2x2x1
jax: 0.10.0
libtpu: 0.0.40
codegen_flags: <defaults>
</compile_context>

<pallas_src>
import jax
import jax.numpy as jnp
from jax.experimental import pallas as pl
from jax.experimental.pallas import tpu as pltpu


def _pos_broadcast_kernel(pos_ref, out_ref):
    # pos_ref: (1, F) lane-dense flat table (constant index_map -> stays resident)
    # out_ref: (TB, F) batch-tile of the flat output slab
    out_ref[...] = jnp.broadcast_to(pos_ref[...], out_ref.shape)


def _choose_batch_tile(batch_size, row_bytes, target_block_bytes=4 << 20):
    """Pick a batch tile: lane-dense block of ~a few MiB, (8,128)-friendly."""
    tb = max(1, target_block_bytes // max(row_bytes, 1))
    if tb >= batch_size:
        # Single block along batch: sublane dim equals the full array dim (legal),
        # and the whole broadcast happens in one grid step.
        return batch_size
    # Multiple of 8 keeps the sublane tiling clean; edge blocks are masked by Pallas.
    return max(8, (tb // 8) * 8)


def learned_positional_encoding_2d(x, pos_embedding, width, height):
    """Forward pass of LearnedPositionalEncoding2D.

    Args:
      x: (B, C, H, W) NCHW input; only the batch size is used (matches PyTorch).
      pos_embedding: (num_patches, embed) learned table.
      width, height: patch-grid dims, width * height == num_patches.

    Returns:
      (B, width, height, embed) array, dtype of pos_embedding.
    """
    batch_size = x.shape[0]
    num_patches, embed = pos_embedding.shape
    assert num_patches == width * height

    flat = num_patches * embed                    # lane-dense last dim (mult of 128 here)
    pos_flat = pos_embedding.reshape(1, flat)     # pure glue, row-major

    row_bytes = flat * pos_embedding.dtype.itemsize
    tb = _choose_batch_tile(batch_size, row_bytes)
    grid = (pl.cdiv(batch_size, tb),)

    # Explicit VMEM budget: 2 double-buffered output blocks + resident table + slack,
    # capped at 32 MiB (safe on v5e scoped 16 MiB default only if we'd need more,
    # and well under v7x's 64 MiB physical).
    block_bytes = tb * row_bytes
    vmem_limit = int(min(32 << 20,
                         max(8 << 20, 2 * block_bytes + 2 * row_bytes + (1 << 20))))

    out_flat = pl.pallas_call(
        _pos_broadcast_kernel,
        out_shape=jax.ShapeDtypeStruct((batch_size, flat), pos_embedding.dtype),
        grid_spec=pltpu.PrefetchScalarGridSpec(
            num_scalar_prefetch=0,
            grid=grid,
            in_specs=[
                # Full flat table every step (block dims == full array dims).
                pl.BlockSpec((1, flat), lambda b: (0, 0)),
            ],
            out_specs=pl.BlockSpec((tb, flat), lambda b: (b, 0)),
        ),
        compiler_params=pltpu.CompilerParams(
            dimension_semantics=("parallel",),
            vmem_limit_bytes=vmem_limit,
        ),
    )(pos_flat)

    # Glue reshape: (B, W*H*E) -> (B, W, H, E), row-major, identical to
    # torch .reshape(width, height, -1) + einops.repeat('w h e -> b w h e').
    return out_flat.reshape(batch_size, width, height, embed)


if __name__ == "__main__":
    # Small, module-consistent shapes: img_size=64, patch_size=16 -> 4x4 grid,
    # num_patches=16; embed_size=32; batch=2, channels=3.
    embed_size = 32
    img_size = 64
    patch_size = 16
    width = height = img_size // patch_size
    num_patches = width * height

    key = jax.random.PRNGKey(0)
    k_pos, k_x = jax.random.split(key)

    # Deterministic "learned" parameter (torch.randn-equivalent init).
    pos_embedding = jax.random.normal(
        k_pos, (num_patches, embed_size), dtype=jnp.float32)

    # NCHW input; only the batch dim matters for this module's forward.
    x = jax.random.normal(k_x, (2, 3, img_size, img_size), dtype=jnp.float32)

    out = learned_positional_encoding_2d(x, pos_embedding, width, height)
    out = jax.block_until_ready(out)

    # Reference check (pure JAX) — same semantics as the PyTorch forward.
    ref = jnp.broadcast_to(
        pos_embedding.reshape(width, height, embed_size)[None],
        (x.shape[0], width, height, embed_size))
    assert out.shape == (x.shape[0], width, height, embed_size)
    assert out.dtype == pos_embedding.dtype
    assert jnp.array_equal(out, ref)

    print("KERNEL_OK")
</pallas_src>

<mosaic_0001>
module attributes {stable_mosaic.version = 11 : i64} {
  func.func @_pos_broadcast_kernel(%arg0: i32, %arg1: memref<1x512xf32, #tpu.memory_space<vmem>>, %arg2: memref<2x512xf32, #tpu.memory_space<vmem>>) attributes {dimension_semantics = [#tpu.dimension_semantics<parallel>], iteration_bounds = array<i64: 1>, scalar_prefetch = 0 : i64, scratch_operands = 0 : i64, tpu.core_type = #tpu.core_type<tc>, window_params = [{pipeline_mode = #tpu.pipeline_mode<synchronous>, transform_indices = @transform_0, window_bounds = array<i64: 1, 512>}, {transform_indices = @transform_1, window_bounds = array<i64: 2, 512>}]} {
    %c0 = arith.constant 0 : index
    %c0_0 = arith.constant 0 : index
    %0 = vector.load %arg1[%c0, %c0_0] : memref<1x512xf32, #tpu.memory_space<vmem>>, vector<1x512xf32>
    %1 = vector.shape_cast %0 : vector<1x512xf32> to vector<1x512xf32>
    %2 = vector.broadcast %1 : vector<1x512xf32> to vector<2x512xf32>
    %c0_1 = arith.constant 0 : index
    %c0_2 = arith.constant 0 : index
    %3 = vector.load %arg2[%c0_1, %c0_2] : memref<2x512xf32, #tpu.memory_space<vmem>>, vector<2x512xf32>
    tpu.vector_store %arg2[%c0_1, %c0_2], %2 {strides = array<i32>} : memref<2x512xf32, #tpu.memory_space<vmem>>, vector<2x512xf32>,
    return
  }
  func.func @transform_0(%arg0: i32) -> (i32, i32) {
    %c0_i32 = arith.constant 0 : i32
    %c0_i32_0 = arith.constant 0 : i32
    %c0_i32_1 = arith.constant 0 : i32
    return %c0_i32, %c0_i32_0 : i32, i32
  }
  func.func @transform_1(%arg0: i32) -> (i32, i32) {
    %c0_i32 = arith.constant 0 : i32
    %c0_i32_0 = arith.constant 0 : i32
    return %arg0, %c0_i32 : i32, i32
  }
}

</mosaic_0001>

<bundles_post_ra>
// kernel: tpu_custom_call.1
= control target key start
LH: loop header
LB: loop body
LE: loop exit
PB: predicated region body
PF: predicated region fallthrough
CT: control target
= control target key end

     0   :  { %6 = vsyncpa [#allocation3], 0  ;;  %s161_s0 = inlined_call_operand.hbm [shape: f32[1,512], index: 0, kind: input, shape index: {}]   ;;  %s162_s1 = inlined_call_operand.hbm [shape: f32[2,512], index: 1, kind: output, shape index: {}]  }
   0x1   :  { %7 = vsyncpa [#allocation4], 0  ;;  %s124_s6 = smov [#allocation2]   ;;  %s76_s10 = scalar_lea.hbm %s161_s0, 64 }
   0x2   :  { %s14_s7 = sshll.u32 %s124_s6, 4  ;;  %p77_p0 = scmp.ne.s32.totalorder %s161_s0, %s76_s10  ;;  %s15_s7 = int_to_ptr.vmem [resolvable:$true] %s14_s7 }
   0x3   :  { %p80_p1 = scmp.lt.u32.totalorder %s76_s10, %s161_s0 }
   0x5   :  { %p82_p2 = pnand %p80_p1, %p77_p0 }
   0x7   :  { %85 = shalt.err (!%p82_p2)
}
   0x8   :  { %s86_s15 = scalar_lea.vmem %s15_s7, 64  ;;  %p91_p4 = scmp.lt.s32.totalorder %s15_s7, %s15_s7 }
   0x9   :  { %p87_p3 = scmp.ne.s32.totalorder %s15_s7, %s86_s15  ;;  %p92_p5 = scmp.lt.s32.totalorder %s86_s15, %s86_s15 }
   0xb   :  { %p93_p6 = por %p92_p5, %p91_p4 }
   0xd   :  { %p94_p7 = pnand %p93_p6, %p87_p3 }
   0xf   :  { %97 = shalt.err (!%p94_p7)
}
  0x10   :  { %17 = dma.hbm_to_vmem [thread:$0]  %s161_s0, 64, %s15_s7, [#allocation3]  }
  0x11   :  { %120 = dma.done.wait [#allocation3], 64  }
  0x12   :  { %121 = vsyncadd [#allocation3], 4294967232  ;;  %v23_v0 = vlaneseq  ;;  %v125_v1 = vmov 1983009808   ;;  %v21_v9 = vld [vmem:[#allocation2] sm:$0xf] }
  0x13   :  { %v42_v2 = vunpack.c.l.s4 %v125_v1  ;;  %s126_s0 = smov [#allocation5]  }
  0x14   :  { %v24_v3 = vshrl.u32 %v23_v0, 7  ;;  %s64_s18 = sshll.u32 %s126_s0, 4  ;;  %s65_s18 = int_to_ptr.vmem [resolvable:$true] %s64_s18 }
  0x15   :  { %v43_v4 = vunpack.c.0.s8 %v42_v2  ;;  %s98_s19 = scalar_lea.vmem %s65_s18, 128  ;;  %p103_p9 = scmp.lt.s32.totalorder %s65_s18, %s65_s18 }
  0x16   :  { %v25_v5 = vsub.s32 0, %v24_v3  ;;  %v29_v6 = vsub.s32 1, %v24_v3  ;;  %v33_v7 = vsub.s32 2, %v24_v3  ;;  %v37_v8 = vsub.s32 3, %v24_v3  ;;  %p99_p8 = scmp.ne.s32.totalorder %s65_s18, %s98_s19  ;;  %p104_p10 = scmp.lt.s32.totalorder %s98_s19, %s98_s19 }
  0x17   :  { %v46_v10 = vsub.s32 %v43_v4, %v24_v3 }
  0x18   :  { %v26_v11 = vrot.slane %v21_v9, %v25_v5  ;;  %v30_v12 = vrot.slane %v21_v9, %v29_v6  ;;  %v34_v13 = vrot.slane %v21_v9, %v33_v7  ;;  %v38_v14 = vrot.slane %v21_v9, %v37_v8  ;;  %p105_p11 = por %p104_p10, %p103_p9 }
  0x1a   :  { %v39_v15 = vcombine.low %v26_v11, %v30_v12  ;;  %v40_v16 = vcombine.low %v34_v13, %v38_v14  ;;  %p106_p12 = pnand %p105_p11, %p99_p8 }
  0x1c   :  { %v47_v17 = vrot.slane %v39_v15, %v46_v10  ;;  %v54_v18 = vrot.slane %v40_v16, %v46_v10 }
  0x1e   :  { %v55_v19 = vcombine.low %v47_v17, %v54_v18 }
  0x20   :  { %57 = vst [vmem:[#allocation5] sm:$0xff] %v55_v19 }
  0x21   :  { %109 = shalt.err (!%p106_p12)
}
  0x22   :  { %s110_s22 = scalar_lea.hbm %s162_s1, 128 }
  0x23   :  { %p111_p13 = scmp.ne.s32.totalorder %s162_s1, %s110_s22  ;;  %p114_p0 = scmp.lt.u32.totalorder %s110_s22, %s162_s1 }
  0x25   :  { %p116_p1 = pnand %p114_p0, %p111_p13 }
  0x27   :  { %119 = shalt.err (!%p116_p1)
}
  0x28   :  { %67 = dma.vmem_to_hbm [thread:$0]  %s65_s18, 128, %s162_s1, [#allocation4]  }
  0x29   :  { %122 = dma.done.wait [#allocation4], 128  }
  0x2a   :  { %123 = vsyncadd [#allocation4], 4294967168 }
  0x2b   :  { %71 = vsyncpa [#allocation3], 1 }
  0x2c   :  { %72 = vsyncpa [#allocation4], 1 }

</bundles_post_ra>
